<compile_context>
chip_gen: v6e
topology: v6e:2x2x1
jax: 0.10.0
libtpu: 0.0.40
codegen_flags: <defaults>
</compile_context>

<pallas_src>
import jax
import jax.numpy as jnp
import numpy as np
from jax.experimental import pallas as pl
from jax.experimental.pallas import tpu as pltpu


def _round_up(n, m):
    return ((n + m - 1) // m) * m


def value_net_kernel(xT_ref, w1_ref, b1_ref, w2c_ref, b2_ref, out_ref):
    """One batch tile of the value head, batch on the lane axis.

    xT_ref : (obs, TB)  observations transposed; batch along lanes
    w1_ref : (H, obs)   layer-1 weight, PyTorch (out, in) layout, VMEM-resident
    b1_ref : (H, 1)     layer-1 bias column (broadcasts over lanes)
    w2c_ref: (H, 1)     layer-2 weight as a column (broadcasts over lanes)
    b2_ref : (1,)       layer-2 bias scalar in SMEM
    out_ref: (1, TB)    value per batch element — lane-dense store
    """
    obs = xT_ref.shape[0]
    xT = xT_ref[...]                                        # (obs, TB), small load

    if obs <= 8:
        # K = obs is tiny -> MXU would be almost entirely idle; do layer 1 as
        # `obs` VPU outer-product multiply-adds, fused with bias + ReLU.
        acc = b1_ref[...]                                   # (H, 1)
        w1 = w1_ref[...]                                    # (H, obs)
        for k in range(obs):                                # static, unrolled
            acc = acc + w1[:, k:k + 1] * xT[k:k + 1, :]     # (H,1)*(1,TB)->(H,TB)
        h = jnp.maximum(acc, 0.0)
    else:
        # General fallback for larger obs: regular MXU matmul, f32 accumulation.
        h = jnp.dot(w1_ref[...], xT, preferred_element_type=jnp.float32)
        h = jnp.maximum(h + b1_ref[...], 0.0)

    # Layer 2: M = 1, so a (1,H)@(H,TB) MXU matmul wastes 7/8 sublanes and
    # reloads h as weights per lane chunk.  VPU multiply + sublane reduction
    # over the hidden axis instead.
    v = jnp.sum(w2c_ref[...] * h, axis=0, keepdims=True)    # (1, TB)
    out_ref[...] = (v + b2_ref[0]).astype(out_ref.dtype)


def value_network_forward_t(xT, params, *, block_b=4096):
    """Forward on an already-transposed batch.  xT: (obs, B).  Returns (B, 1)."""
    w1, b1c, w2c, b2s = params
    obs, B = xT.shape
    hidden = w1.shape[0]

    # Tile selection:
    #   * block_b forced to a multiple of 128 (lane-density guard),
    #   * large tiles by default (amortize ~0.35 us per grid step),
    #   * cap at ceil(B/2) rounded to 128 so large batches produce >= 2 grid
    #     tiles and both v7x TensorCores get work.
    block_b = max(128, _round_up(block_b, 128))
    half_b = _round_up(max((B + 1) // 2, 1), 128)
    TB = min(block_b, half_b)
    G = pl.cdiv(B, TB)          # partial last input tile handled by Pallas; no pad

    out2d = pl.pallas_call(
        value_net_kernel,
        out_shape=jax.ShapeDtypeStruct((G, TB), jnp.float32),
        grid=(G,),
        in_specs=[
            pl.BlockSpec((obs, TB), lambda i: (0, i)),            # x tile (streamed)
            pl.BlockSpec((hidden, obs), lambda i: (0, 0)),        # w1, VMEM-resident
            pl.BlockSpec((hidden, 1), lambda i: (0, 0)),          # b1 column
            pl.BlockSpec((hidden, 1), lambda i: (0, 0)),          # w2 column
            pl.BlockSpec(memory_space=pltpu.MemorySpace.SMEM),    # b2 scalar
        ],
        out_specs=pl.BlockSpec((1, TB), lambda i: (i, 0)),        # lane-dense output
        compiler_params=pltpu.CompilerParams(
            dimension_semantics=("parallel",),   # independent batch tiles (megacore)
        ),
    )(xT, w1, b1c, w2c, b2s)

    return out2d.reshape(G * TB)[:B].reshape(B, 1)


def value_network_forward(x, params, *, block_b=4096):
    """PyTorch-layout interface.  x: (B, obs) f32.  Returns (B, 1).

    Keeping rollout / minibatch buffers in (obs, B) layout upstream and calling
    value_network_forward_t directly removes this transpose copy.
    """
    return value_network_forward_t(x.T, params, block_b=block_b)


def init_params(key, obs_size, hidden=128):
    # PyTorch nn.Linear default init: U(-1/sqrt(fan_in), 1/sqrt(fan_in)),
    # weights in PyTorch layout (out_features, in_features).
    k1, k2, k3, k4 = jax.random.split(key, 4)
    bound1 = 1.0 / np.sqrt(obs_size)
    bound2 = 1.0 / np.sqrt(hidden)
    w1 = jax.random.uniform(k1, (hidden, obs_size), jnp.float32, -bound1, bound1)
    b1 = jax.random.uniform(k2, (hidden,), jnp.float32, -bound1, bound1)
    w2 = jax.random.uniform(k3, (1, hidden), jnp.float32, -bound2, bound2)
    b2 = jax.random.uniform(k4, (1,), jnp.float32, -bound2, bound2)
    return w1, b1, w2, b2


def prepare_params(w1, b1, w2, b2):
    """One-time layout plumbing, hoisted out of the per-forward hot path."""
    hidden = w1.shape[0]
    return (
        w1.astype(jnp.float32),                       # (H, obs)
        b1.reshape(hidden, 1).astype(jnp.float32),    # (H, 1) column
        w2.reshape(hidden, 1).astype(jnp.float32),    # (H, 1) column (from (1, H))
        b2.reshape(1).astype(jnp.float32),            # (1,) SMEM scalar
    )


if __name__ == "__main__":
    key = jax.random.PRNGKey(0)
    obs_size = 2          # MountainCarContinuous-v0 observation dim
    hidden = 128

    kx, kp, kx2 = jax.random.split(key, 3)
    w1, b1, w2, b2 = init_params(kp, obs_size, hidden)
    params = prepare_params(w1, b1, w2, b2)

    # Pure-JAX reference (PyTorch semantics: relu(x @ W1^T + b1) @ W2^T + b2)
    def torch_ref(x):
        return jnp.maximum(x @ w1.T + b1, 0.0) @ w2.T + b2

    # Small batch (single grid tile).
    x_small = jax.random.normal(kx, (8, obs_size), jnp.float32)
    out_small = jax.block_until_ready(value_network_forward(x_small, params))
    np.testing.assert_allclose(np.asarray(out_small), np.asarray(torch_ref(x_small)),
                               rtol=1e-5, atol=1e-5)

    # Non-multiple-of-128 batch: exercises >=2 grid tiles + a partial input tile.
    x_big = jax.random.normal(kx2, (300, obs_size), jnp.float32)
    out_big = jax.block_until_ready(value_network_forward(x_big, params))
    np.testing.assert_allclose(np.asarray(out_big), np.asarray(torch_ref(x_big)),
                               rtol=1e-5, atol=1e-5)

    print("KERNEL_OK")
</pallas_src>

<mosaic_0001>
module attributes {stable_mosaic.version = 11 : i64} {
  func.func @value_net_kernel(%arg0: i32, %arg1: memref<2x128xf32, #tpu.memory_space<vmem>>, %arg2: memref<128x2xf32, #tpu.memory_space<vmem>>, %arg3: memref<128x1xf32, #tpu.memory_space<vmem>>, %arg4: memref<128x1xf32, #tpu.memory_space<vmem>>, %arg5: memref<1xf32, #tpu.memory_space<smem>>, %arg6: memref<1x128xf32, #tpu.memory_space<vmem>>) attributes {dimension_semantics = [#tpu.dimension_semantics<parallel>], iteration_bounds = array<i64: 1>, scalar_prefetch = 0 : i64, scratch_operands = 0 : i64, tpu.core_type = #tpu.core_type<tc>, window_params = [{transform_indices = @transform_0, window_bounds = array<i64: 2, 128>}, {pipeline_mode = #tpu.pipeline_mode<synchronous>, transform_indices = @transform_1, window_bounds = array<i64: 128, 2>}, {pipeline_mode = #tpu.pipeline_mode<synchronous>, transform_indices = @transform_2, window_bounds = array<i64: 128, 1>}, {pipeline_mode = #tpu.pipeline_mode<synchronous>, transform_indices = @transform_3, window_bounds = array<i64: 128, 1>}, {transform_indices = @transform_4, window_bounds = array<i64: 1>}, {transform_indices = @transform_5, window_bounds = array<i64: 1, 128>}]} {
    %c0 = arith.constant 0 : index
    %c0_0 = arith.constant 0 : index
    %0 = vector.load %arg1[%c0, %c0_0] : memref<2x128xf32, #tpu.memory_space<vmem>>, vector<2x128xf32>
    %c0_1 = arith.constant 0 : index
    %c0_2 = arith.constant 0 : index
    %1 = vector.load %arg3[%c0_1, %c0_2] : memref<128x1xf32, #tpu.memory_space<vmem>>, vector<128x1xf32>
    %c0_3 = arith.constant 0 : index
    %c0_4 = arith.constant 0 : index
    %2 = vector.load %arg2[%c0_3, %c0_4] : memref<128x2xf32, #tpu.memory_space<vmem>>, vector<128x2xf32>
    %3 = vector.extract_strided_slice %2 {offsets = [0, 0], sizes = [128, 1], strides = [1, 1]} : vector<128x2xf32> to vector<128x1xf32>
    %4 = vector.extract_strided_slice %0 {offsets = [0, 0], sizes = [1, 128], strides = [1, 1]} : vector<2x128xf32> to vector<1x128xf32>
    %5 = vector.broadcast %3 : vector<128x1xf32> to vector<128x128xf32>
    %6 = vector.broadcast %4 : vector<1x128xf32> to vector<128x128xf32>
    %7 = arith.mulf %5, %6 : vector<128x128xf32>
    %8 = vector.broadcast %1 : vector<128x1xf32> to vector<128x128xf32>
    %9 = arith.addf %8, %7 : vector<128x128xf32>
    %10 = vector.extract_strided_slice %2 {offsets = [0, 1], sizes = [128, 1], strides = [1, 1]} : vector<128x2xf32> to vector<128x1xf32>
    %11 = vector.extract_strided_slice %0 {offsets = [1, 0], sizes = [1, 128], strides = [1, 1]} : vector<2x128xf32> to vector<1x128xf32>
    %12 = vector.broadcast %10 : vector<128x1xf32> to vector<128x128xf32>
    %13 = vector.broadcast %11 : vector<1x128xf32> to vector<128x128xf32>
    %14 = arith.mulf %12, %13 : vector<128x128xf32>
    %15 = arith.addf %9, %14 : vector<128x128xf32>
    %cst = arith.constant 0.000000e+00 : f32
    %16 = vector.broadcast %cst : f32 to vector<128x128xf32>
    %17 = arith.maximumf %15, %16 : vector<128x128xf32>
    %c0_5 = arith.constant 0 : index
    %c0_6 = arith.constant 0 : index
    %18 = vector.load %arg4[%c0_5, %c0_6] : memref<128x1xf32, #tpu.memory_space<vmem>>, vector<128x1xf32>
    %19 = vector.broadcast %18 : vector<128x1xf32> to vector<128x128xf32>
    %20 = arith.mulf %19, %17 : vector<128x128xf32>
    %cst_7 = arith.constant dense<0.000000e+00> : vector<128xf32>
    %21 = vector.multi_reduction <add>, %20, %cst_7 [0] : vector<128x128xf32> to vector<128xf32>
    %22 = vector.shape_cast %21 : vector<128xf32> to vector<1x128xf32>
    %c0_8 = arith.constant 0 : index
    %23 = memref.load %arg5[%c0_8] : memref<1xf32, #tpu.memory_space<smem>>
    %24 = vector.broadcast %23 : f32 to vector<1x128xf32>
    %25 = arith.addf %22, %24 : vector<1x128xf32>
    %c0_9 = arith.constant 0 : index
    %c0_10 = arith.constant 0 : index
    %26 = vector.load %arg6[%c0_9, %c0_10] : memref<1x128xf32, #tpu.memory_space<vmem>>, vector<1x128xf32>
    tpu.vector_store %arg6[%c0_9, %c0_10], %25 {strides = array<i32>} : memref<1x128xf32, #tpu.memory_space<vmem>>, vector<1x128xf32>,
    return
  }
  func.func @transform_0(%arg0: i32) -> (i32, i32) {
    %c0_i32 = arith.constant 0 : i32
    %c0_i32_0 = arith.constant 0 : i32
    return %c0_i32, %arg0 : i32, i32
  }
  func.func @transform_1(%arg0: i32) -> (i32, i32) {
    %c0_i32 = arith.constant 0 : i32
    %c0_i32_0 = arith.constant 0 : i32
    %c0_i32_1 = arith.constant 0 : i32
    return %c0_i32, %c0_i32_0 : i32, i32
  }
  func.func @transform_2(%arg0: i32) -> (i32, i32) {
    %c0_i32 = arith.constant 0 : i32
    %c0_i32_0 = arith.constant 0 : i32
    %c0_i32_1 = arith.constant 0 : i32
    return %c0_i32, %c0_i32_0 : i32, i32
  }
  func.func @transform_3(%arg0: i32) -> (i32, i32) {
    %c0_i32 = arith.constant 0 : i32
    %c0_i32_0 = arith.constant 0 : i32
    %c0_i32_1 = arith.constant 0 : i32
    return %c0_i32, %c0_i32_0 : i32, i32
  }
  func.func @transform_4(%arg0: i32) -> i32 {
    %c0_i32 = arith.constant 0 : i32
    %c0_i32_0 = arith.constant 0 : i32
    return %c0_i32 : i32
  }
  func.func @transform_5(%arg0: i32) -> (i32, i32) {
    %c0_i32 = arith.constant 0 : i32
    %c0_i32_0 = arith.constant 0 : i32
    return %arg0, %c0_i32 : i32, i32
  }
}

</mosaic_0001>

<bundles_post_ra>
// kernel: tpu_custom_call.1
= control target key start
LH: loop header
LB: loop body
LE: loop exit
PB: predicated region body
PF: predicated region fallthrough
CT: control target
= control target key end

     0   :  { %v550_v2 = vmov 1   ;;  %v551_v3 = vmov 0   ;;  %s884_s0 = inlined_call_operand.vmem [shape: f32[2,8], index: 0, kind: input, shape index: {}]   ;;  %s885_s1 = inlined_call_operand.vmem [shape: f32[128,2], index: 1, kind: input, shape index: {}]   ;;  %s886_s2 = inlined_call_operand.vmem [shape: f32[128,1], index: 2, kind: input, shape index: {}]   ;;  %s887_s3 = inlined_call_operand.vmem [shape: f32[128,1], index: 3, kind: input, shape index: {}]   ;;  %s888_s4 = inlined_call_operand.<no memory space> [shape: f32[1], index: 4, kind: input, shape index: {}]   ;;  %s889_s5 = inlined_call_operand.hbm [shape: f32[1,128], index: 5, kind: output, shape index: {}]  }
   0x1   :  { %v586_v0 = vld [vmem:[%s885_s1 + $0x10] sm:$0xff]  ;;  %v39_v1 = vld [vmem:[%s885_s1] sm:$0xff]  ;;  %522 = vset.pattern.permute.xlu0 %v550_v2  ;;  %521 = vset.pattern.permute.xlu1 %v551_v3  ;;  %v42_v4 = vld [vmem:[%s885_s1 + $0x18] sm:$0xff] }
   0x2   :  { %67 = vperm.xlu1 %521, %v586_v0   ;;  %252 = vperm.xlu0 %522, %v39_v1   ;;  %v600_v5 = vld [vmem:[%s885_s1 + $0x28] sm:$0xff]  ;;  %v607_v6 = vld [vmem:[%s885_s1 + $0x38] sm:$0xff]  ;;  %v43_v9 = vld [vmem:[%s885_s1 + $0x20] sm:$0xff] }
   0x3   :  { %v40_v7 = vld [vmem:[%s885_s1 + $0x8] sm:$0xff] }
   0x4   :  { %v616_v8 = vld [vmem:[%s885_s1 + $0x48] sm:$0xff] }
   0x6   :  { %72 = vperm.xlu1 %521, %v42_v4   ;;  %264 = vperm.xlu0 %522, %v42_v4  }
   0xa   :  { %82 = vperm.xlu1 %521, %v600_v5   ;;  %524 = vset.pattern.permute.xlu0 %v551_v3 }
   0xb   :  { %57 = vperm.xlu0 %524, %v39_v1  }
   0xe   :  { %92 = vperm.xlu1 %521, %v607_v6  }
   0xf   :  { %62 = vperm.xlu0 %524, %v40_v7  }
  0x10   :  { %11 = vsyncpa [#allocation4], 0  ;;  %v625_v10 = vld [vmem:[%s885_s1 + $0x58] sm:$0xff]  ;;  %v630_v11 = vld [vmem:[%s885_s1 + $0x30] sm:$0xff]  ;;  %v135_v61 = vlaneseq  ;;  %s552_s11 = smov [#allocation3]  }
  0x11   :  { %v637_v12 = vld [vmem:[%s885_s1 + $0x68] sm:$0xff]  ;;  %v642_v13 = vld [vmem:[%s885_s1 + $0x40] sm:$0xff]  ;;  %v649_v14 = vld [vmem:[%s885_s1 + $0x78] sm:$0xff]  ;;  %s510_s12 = sshll.u32 %s552_s11, 4  ;;  %s511_s12 = int_to_ptr.vmem [resolvable:$true] %s510_s12 }
  0x12   :  { %102 = vperm.xlu1 %521, %v616_v8   ;;  %v654_v15 = vld [vmem:[%s885_s1 + $0x50] sm:$0xff]  ;;  %v24_v16 = vld [vmem:[%s886_s2 + $0x8] sm:$0xff]  ;;  %v664_v17 = vld [vmem:[%s885_s1 + $0x60] sm:$0xff]  ;;  %s528_s13 = scalar_lea.vmem %s511_s12, 16  ;;  %s532_s14 = scalar_lea.vmem %s511_s12, 32 }
  0x13   :  { %77 = vperm.xlu0 %524, %v43_v9   ;;  %v26_v18 = vld [vmem:[%s886_s2 + $0x18] sm:$0xff]  ;;  %v673_v19 = vld [vmem:[%s885_s1 + $0x70] sm:$0xff]  ;;  %v28_v20 = vld [vmem:[%s886_s2 + $0x28] sm:$0xff]  ;;  %p529_p0 = scmp.ne.s32.totalorder %s511_s12, %s528_s13  ;;  %p533_p1 = scmp.lt.s32.totalorder %s511_s12, %s511_s12 }
  0x14   :  { %v23_v21 = vld [vmem:[%s886_s2] sm:$0xff]  ;;  %v30_v22 = vld [vmem:[%s886_s2 + $0x38] sm:$0xff]  ;;  %v25_v23 = vld [vmem:[%s886_s2 + $0x10] sm:$0xff]  ;;  %p534_p2 = scmp.lt.s32.totalorder %s532_s14, %s528_s13 }
  0x15   :  { %v32_v24 = vld [vmem:[%s886_s2 + $0x48] sm:$0xff]  ;;  %v27_v25 = vld [vmem:[%s886_s2 + $0x20] sm:$0xff]  ;;  %v34_v26 = vld [vmem:[%s886_s2 + $0x58] sm:$0xff] }
  0x16   :  { %112 = vperm.xlu1 %521, %v625_v10   ;;  %v29_v27 = vld [vmem:[%s886_s2 + $0x30] sm:$0xff]  ;;  %v36_v28 = vld [vmem:[%s886_s2 + $0x68] sm:$0xff]  ;;  %v31_v29 = vld [vmem:[%s886_s2 + $0x40] sm:$0xff]  ;;  %p535_p3 = por %p534_p2, %p533_p1 }
  0x17   :  { %87 = vperm.xlu0 %524, %v630_v11   ;;  %v38_v30 = vld [vmem:[%s886_s2 + $0x78] sm:$0xff]  ;;  %v33_v31 = vld [vmem:[%s886_s2 + $0x50] sm:$0xff]  ;;  %v35_v32 = vld [vmem:[%s886_s2 + $0x60] sm:$0xff] }
  0x18   :  { %v37_v33 = vld [vmem:[%s886_s2 + $0x70] sm:$0xff]  ;;  %v367_v34 = vld [vmem:[%s887_s3] sm:$0xff]  ;;  %v368_v36 = vld [vmem:[%s887_s3 + $0x8] sm:$0xff]  ;;  %p536_p4 = pnand %p535_p3, %p529_p0 }
  0x19   :  { %v369_v35 = vld [vmem:[%s887_s3 + $0x10] sm:$0xff]  ;;  %v370_v37 = vld [vmem:[%s887_s3 + $0x18] sm:$0xff]  ;;  %v371_v38 = vld [vmem:[%s887_s3 + $0x20] sm:$0xff] }
  0x1a   :  { %122 = vperm.xlu1 %521, %v637_v12   ;;  %v372_v39 = vld [vmem:[%s887_s3 + $0x28] sm:$0xff]  ;;  %v373_v40 = vld [vmem:[%s887_s3 + $0x30] sm:$0xff]  ;;  %v374_v41 = vld [vmem:[%s887_s3 + $0x38] sm:$0xff] }
  0x1b   :  { %97 = vperm.xlu0 %524, %v642_v13   ;;  %v375_v42 = vld [vmem:[%s887_s3 + $0x40] sm:$0xff]  ;;  %v376_v43 = vld [vmem:[%s887_s3 + $0x48] sm:$0xff]  ;;  %v377_v44 = vld [vmem:[%s887_s3 + $0x50] sm:$0xff] }
  0x1c   :  { %v378_v45 = vld [vmem:[%s887_s3 + $0x58] sm:$0xff]  ;;  %v379_v46 = vld [vmem:[%s887_s3 + $0x60] sm:$0xff]  ;;  %v381_v47 = vld [vmem:[%s887_s3 + $0x70] sm:$0xff] }
  0x1d   :  { %v380_v50 = vld [vmem:[%s887_s3 + $0x68] sm:$0xff]  ;;  %v382_v53 = vld [vmem:[%s887_s3 + $0x78] sm:$0xff] }
  0x1e   :  { %132 = vperm.xlu1 %521, %v649_v14  }
  0x1f   :  { %107 = vperm.xlu0 %524, %v654_v15  }
  0x22   :  { %162 = vperm.xlu1 %521, %v24_v16  }
  0x23   :  { %117 = vperm.xlu0 %524, %v664_v17  }
  0x26   :  { %172 = vperm.xlu1 %521, %v26_v18  }
  0x27   :  { %127 = vperm.xlu0 %524, %v673_v19  }
  0x2a   :  { %182 = vperm.xlu1 %521, %v28_v20  }
  0x2b   :  { %157 = vperm.xlu0 %524, %v23_v21  }
  0x2e   :  { %192 = vperm.xlu1 %521, %v30_v22  }
  0x2f   :  { %167 = vperm.xlu0 %524, %v25_v23  }
  0x32   :  { %202 = vperm.xlu1 %521, %v32_v24  }
  0x33   :  { %177 = vperm.xlu0 %524, %v27_v25  }
  0x36   :  { %212 = vperm.xlu1 %521, %v34_v26  }
  0x37   :  { %187 = vperm.xlu0 %524, %v29_v27  }
  0x3a   :  { %222 = vperm.xlu1 %521, %v36_v28  }
  0x3b   :  { %197 = vperm.xlu0 %524, %v31_v29  }
  0x3e   :  { %232 = vperm.xlu1 %521, %v38_v30  }
  0x3f   :  { %207 = vperm.xlu0 %524, %v33_v31  }
  0x42   :  { %523 = vset.pattern.permute.xlu1 %v550_v2 }
  0x43   :  { %256 = vperm.xlu1 %523, %v40_v7   ;;  %217 = vperm.xlu0 %524, %v35_v32  }
  0x47   :  { %260 = vperm.xlu1 %523, %v586_v0   ;;  %227 = vperm.xlu0 %524, %v37_v33   ;;  %v136_v0 = vshrl.u32 %v135_v61, 7 }
  0x49   :  { %v317_v4 = vsub.s32 1, %v136_v0 }
  0x4b   :  { %268 = vperm.xlu1 %523, %v43_v9   ;;  %385 = vperm.xlu0 %524, %v367_v34  }
  0x4f   :  { %525 = vset.pattern.permute.xlu1 %v551_v3  ;;  %395 = vperm.xlu0 %524, %v369_v35  }
  0x50   :  { %390 = vperm.xlu1 %525, %v368_v36  }
  0x53   :  { %400 = vperm.xlu0 %524, %v370_v37  }
  0x54   :  { %526 = vset.pattern.permute.xlu1 %v550_v2 }
  0x55   :  { %272 = vperm.xlu1 %526, %v600_v5  }
  0x57   :  { %405 = vperm.xlu0 %524, %v371_v38  }
  0x59   :  { %276 = vperm.xlu1 %526, %v630_v11  }
  0x5b   :  { %410 = vperm.xlu0 %524, %v372_v39  }
  0x5d   :  { %280 = vperm.xlu1 %526, %v607_v6   ;;  %v22_v6 = vld [vmem:[%s884_s0] sm:$0x3] }
  0x5e   :  { %v805_v9 = vrot.slane %v22_v6, %v317_v4 }
  0x5f   :  { %415 = vperm.xlu0 %524, %v373_v40  }
  0x61   :  { %284 = vperm.xlu1 %526, %v642_v13  }
  0x63   :  { %420 = vperm.xlu0 %524, %v374_v41  }
  0x65   :  { %288 = vperm.xlu1 %526, %v616_v8  }
  0x67   :  { %425 = vperm.xlu0 %524, %v375_v42  }
  0x69   :  { %292 = vperm.xlu1 %526, %v654_v15  }
  0x6b   :  { %430 = vperm.xlu0 %524, %v376_v43  }
  0x6d   :  { %296 = vperm.xlu1 %526, %v625_v10  }
  0x6f   :  { %435 = vperm.xlu0 %524, %v377_v44  }
  0x71   :  { %300 = vperm.xlu1 %526, %v664_v17  }
  0x73   :  { %440 = vperm.xlu0 %524, %v378_v45  }
  0x75   :  { %304 = vperm.xlu1 %526, %v637_v12  }
  0x77   :  { %445 = vperm.xlu0 %524, %v379_v46  }
  0x79   :  { %308 = vperm.xlu1 %526, %v673_v19  }
  0x7b   :  { %455 = vperm.xlu0 %524, %v381_v47  }
  0x7d   :  { %v68_v48 = vpop.permute.xlu1 %67  ;;  %312 = vperm.xlu1 %526, %v649_v14   ;;  %v253_v49 = vpop.permute.xlu0 %252 }
  0x7e   :  { %v319_v20 = vmul.f32 %v805_v9, %v253_v49 }
  0x81   :  { %v73_v51 = vpop.permute.xlu1 %72  ;;  %527 = vset.pattern.permute.xlu1 %v551_v3  ;;  %v265_v52 = vpop.permute.xlu0 %264  ;;  %v137_v3 = vsub.s32 0, %v136_v0 }
  0x82   :  { %450 = vperm.xlu1 %527, %v380_v50   ;;  %v322_v13 = vmul.f32 %v805_v9, %v265_v52 }
  0x83   :  { %v803_v8 = vrot.slane %v22_v6, %v137_v3 }
  0x85   :  { %v782_v54 = vpop.permute.xlu1 %82  ;;  %v142_v11 = vmul.f32 %v803_v8, %v73_v51  ;;  %v141_v39 = vmul.f32 %v803_v8, %v68_v48 }
  0x86   :  { %v58_v55 = vpop.permute.xlu0 %57  ;;  %460 = vperm.xlu1 %527, %v382_v53  }
  0x87   :  { %v139_v17 = vmul.f32 %v803_v8, %v58_v55 }
  0x89   :  { %v784_v56 = vpop.permute.xlu1 %92 }
  0x8a   :  { %v63_v57 = vpop.permute.xlu0 %62 }
  0x8b   :  { %v140_v35 = vmul.f32 %v803_v8, %v63_v57 }
  0x8d   :  { %v786_v58 = vpop.permute.xlu1 %102 }
  0x8e   :  { %v78_v59 = vpop.permute.xlu0 %77 }
  0x8f   :  { %v143_v47 = vmul.f32 %v803_v8, %v78_v59 }
  0x91   :  { %v788_v60 = vpop.permute.xlu1 %112 }
  0x92   :  { %v790_v62 = vpop.permute.xlu0 %87 }
  0x95   :  { %v792_v63 = vpop.permute.xlu1 %122 }
  0x96   :  { %v794_v1 = vpop.permute.xlu0 %97 }
  0x99   :  { %v796_v2 = vpop.permute.xlu1 %132 }
  0x9a   :  { %v798_v5 = vpop.permute.xlu0 %107 }
  0x9d   :  { %v163_v7 = vpop.permute.xlu1 %162 }
  0x9e   :  { %v807_v10 = vpop.permute.xlu0 %117  ;;  %v236_v40 = vadd.f32 %v163_v7, %v140_v35 }
  0xa1   :  { %v173_v12 = vpop.permute.xlu1 %172 }
  0xa2   :  { %v238_v14 = vadd.f32 %v173_v12, %v142_v11  ;;  %v811_v15 = vpop.permute.xlu0 %127  ;;  %v144_v11 = vmul.f32 %v803_v8, %v782_v54 }
  0xa4   :  { %v338_v16 = vadd.f32 %v322_v13, %v238_v14 }
  0xa5   :  { %v183_v18 = vpop.permute.xlu1 %182 }
  0xa6   :  { %v158_v19 = vpop.permute.xlu0 %157  ;;  %v354_v3 = vmax.f32 %v338_v16, 0.0  ;;  %v240_v14 = vadd.f32 %v183_v18, %v144_v11  ;;  %v146_v18 = vmul.f32 %v803_v8, %v784_v56 }
  0xa7   :  { %v235_v21 = vadd.f32 %v158_v19, %v139_v17 }
  0xa9   :  { %v335_v22 = vadd.f32 %v319_v20, %v235_v21  ;;  %v193_v23 = vpop.permute.xlu1 %192 }
  0xaa   :  { %v168_v24 = vpop.permute.xlu0 %167 }
  0xab   :  { %v237_v42 = vadd.f32 %v168_v24, %v141_v39  ;;  %v351_v50 = vmax.f32 %v335_v22, 0.0  ;;  %v145_v22 = vmul.f32 %v803_v8, %v790_v62 }
  0xad   :  { %v815_v25 = vpop.permute.xlu1 %202 }
  0xae   :  { %v178_v26 = vpop.permute.xlu0 %177 }
  0xaf   :  { %v239_v53 = vadd.f32 %v178_v26, %v143_v47 }
  0xb1   :  { %v817_v27 = vpop.permute.xlu1 %212 }
  0xb2   :  { %v188_v28 = vpop.permute.xlu0 %187 }
  0xb5   :  { %v819_v29 = vpop.permute.xlu1 %222 }
  0xb6   :  { %v821_v30 = vpop.permute.xlu0 %197 }
  0xb9   :  { %v823_v31 = vpop.permute.xlu1 %232 }
  0xba   :  { %v825_v32 = vpop.permute.xlu0 %207 }
  0xbe   :  { %v257_v33 = vpop.permute.xlu1 %256  ;;  %v827_v34 = vpop.permute.xlu0 %217 }
  0xbf   :  { %v320_v36 = vmul.f32 %v805_v9, %v257_v33  ;;  %v241_v33 = vadd.f32 %v188_v28, %v145_v22  ;;  %v147_v28 = vmul.f32 %v803_v8, %v794_v1 }
  0xc1   :  { %v336_v43 = vadd.f32 %v320_v36, %v236_v40 }
  0xc2   :  { %v261_v37 = vpop.permute.xlu1 %260  ;;  %v831_v38 = vpop.permute.xlu0 %227 }
  0xc3   :  { %v321_v41 = vmul.f32 %v805_v9, %v261_v37  ;;  %v352_v52 = vmax.f32 %v336_v43, 0.0 }
  0xc5   :  { %v337_v46 = vadd.f32 %v321_v41, %v237_v42  ;;  %v242_v42 = vadd.f32 %v193_v23, %v146_v18  ;;  %v148_v23 = vmul.f32 %v803_v8, %v786_v58 }
  0xc6   :  { %v269_v44 = vpop.permute.xlu1 %268  ;;  %v386_v45 = vpop.permute.xlu0 %385 }
  0xc7   :  { %v323_v49 = vmul.f32 %v805_v9, %v269_v44  ;;  %v463_v57 = vmul.f32 %v386_v45, %v351_v50  ;;  %v353_v61 = vmax.f32 %v337_v46, 0.0  ;;  %v243_v50 = vadd.f32 %v821_v30, %v147_v28 }
  0xc8   :  { %v149_v30 = vmul.f32 %v803_v8, %v798_v5 }
  0xc9   :  { %v339_v0 = vadd.f32 %v323_v49, %v239_v53 }
  0xca   :  { %v396_v51 = vpop.permute.xlu0 %395 }
  0xcb   :  { %v391_v55 = vpop.permute.xlu1 %390  ;;  %v465_v4 = vmul.f32 %v396_v51, %v353_v61  ;;  %v355_v19 = vmax.f32 %v339_v0, 0.0 }
  0xcc   :  { %v464_v48 = vmul.f32 %v391_v55, %v352_v52 }
  0xce   :  { %v479_v6 = vadd.f32 %v464_v48, %v463_v57  ;;  %v401_v7 = vpop.permute.xlu0 %400  ;;  %v244_v48 = vadd.f32 %v815_v25, %v148_v23  ;;  %v150_v25 = vmul.f32 %v803_v8, %v788_v60 }
  0xcf   :  { %v466_v12 = vmul.f32 %v401_v7, %v354_v3 }
  0xd0   :  { %v480_v59 = vadd.f32 %v479_v6, %v465_v4  ;;  %v273_v13 = vpop.permute.xlu1 %272 }
  0xd1   :  { %v324_v17 = vmul.f32 %v805_v9, %v273_v13 }
  0xd2   :  { %v481_v20 = vadd.f32 %v480_v59, %v466_v12  ;;  %v406_v21 = vpop.permute.xlu0 %405  ;;  %v245_v12 = vadd.f32 %v825_v32, %v149_v30  ;;  %v151_v32 = vmul.f32 %v803_v8, %v807_v10  ;;  %v152_v10 = vmul.f32 %v803_v8, %v792_v63 }
  0xd3   :  { %v340_v24 = vadd.f32 %v324_v17, %v240_v14  ;;  %v467_v16 = vmul.f32 %v406_v21, %v355_v19  ;;  %v246_v21 = vadd.f32 %v817_v27, %v150_v25 }
  0xd4   :  { %v277_v26 = vpop.permute.xlu1 %276 }
  0xd5   :  { %v482_v35 = vadd.f32 %v481_v20, %v467_v16  ;;  %v325_v36 = vmul.f32 %v805_v9, %v277_v26  ;;  %v356_v54 = vmax.f32 %v340_v24, 0.0 }
  0xd6   :  { %v411_v37 = vpop.permute.xlu0 %410 }
  0xd7   :  { %v341_v39 = vadd.f32 %v325_v36, %v241_v33  ;;  %v468_v40 = vmul.f32 %v411_v37, %v356_v54  ;;  %v247_v36 = vadd.f32 %v827_v34, %v151_v32 }
  0xd8   :  { %v281_v41 = vpop.permute.xlu1 %280 }
  0xd9   :  { %v483_v43 = vadd.f32 %v482_v35, %v468_v40  ;;  %v326_v44 = vmul.f32 %v805_v9, %v281_v41  ;;  %v357_v62 = vmax.f32 %v341_v39, 0.0 }
  0xda   :  { %v416_v45 = vpop.permute.xlu0 %415 }
  0xdb   :  { %v342_v46 = vadd.f32 %v326_v44, %v242_v42  ;;  %v469_v47 = vmul.f32 %v416_v45, %v357_v62  ;;  %v153_v62 = vmul.f32 %v803_v8, %v811_v15 }
  0xdc   :  { %v285_v49 = vpop.permute.xlu1 %284 }
  0xdd   :  { %v484_v51 = vadd.f32 %v483_v43, %v469_v47  ;;  %v327_v56 = vmul.f32 %v805_v9, %v285_v49  ;;  %v358_v52 = vmax.f32 %v342_v46, 0.0  ;;  %v248_v47 = vadd.f32 %v819_v29, %v152_v10 }
  0xde   :  { %v421_v53 = vpop.permute.xlu0 %420  ;;  %v249_v49 = vadd.f32 %v831_v38, %v153_v62 }
  0xdf   :  { %v343_v55 = vadd.f32 %v327_v56, %v243_v50  ;;  %v470_v57 = vmul.f32 %v421_v53, %v358_v52  ;;  %v154_v50 = vmul.f32 %v803_v8, %v796_v2 }
  0xe0   :  { %v289_v61 = vpop.permute.xlu1 %288 }
  0xe1   :  { %v485_v0 = vadd.f32 %v484_v51, %v470_v57  ;;  %v328_v1 = vmul.f32 %v805_v9, %v289_v61  ;;  %v359_v3 = vmax.f32 %v343_v55, 0.0  ;;  %v250_v15 = vadd.f32 %v823_v31, %v154_v50 }
  0xe2   :  { %v426_v4 = vpop.permute.xlu0 %425  ;;  %v501_v31 = vstv %s888_s4 }
  0xe3   :  { %v344_v6 = vadd.f32 %v328_v1, %v244_v48  ;;  %v471_v7 = vmul.f32 %v426_v4, %v359_v3 }
  0xe4   :  { %v293_v11 = vpop.permute.xlu1 %292 }
  0xe5   :  { %v486_v59 = vadd.f32 %v485_v0, %v471_v7  ;;  %v329_v58 = vmul.f32 %v805_v9, %v293_v11  ;;  %v360_v13 = vmax.f32 %v344_v6, 0.0 }
  0xe6   :  { %v431_v14 = vpop.permute.xlu0 %430 }
  0xe7   :  { %v345_v17 = vadd.f32 %v329_v58, %v245_v12  ;;  %v472_v19 = vmul.f32 %v431_v14, %v360_v13 }
  0xe8   :  { %v297_v20 = vpop.permute.xlu1 %296 }
  0xe9   :  { %v487_v22 = vadd.f32 %v486_v59, %v472_v19  ;;  %v330_v5 = vmul.f32 %v805_v9, %v297_v20  ;;  %v361_v24 = vmax.f32 %v345_v17, 0.0 }
  0xea   :  { %v436_v16 = vpop.permute.xlu0 %435 }
  0xeb   :  { %v346_v26 = vadd.f32 %v330_v5, %v246_v21  ;;  %v473_v33 = vmul.f32 %v436_v16, %v361_v24 }
  0xec   :  { %v301_v35 = vpop.permute.xlu1 %300 }
  0xed   :  { %v488_v54 = vadd.f32 %v487_v22, %v473_v33  ;;  %v331_v60 = vmul.f32 %v805_v9, %v301_v35  ;;  %v362_v37 = vmax.f32 %v346_v26, 0.0 }
  0xee   :  { %v441_v18 = vpop.permute.xlu0 %440 }
  0xef   :  { %v347_v39 = vadd.f32 %v331_v60, %v247_v36  ;;  %v474_v27 = vmul.f32 %v441_v18, %v362_v37 }
  0xf0   :  { %v305_v40 = vpop.permute.xlu1 %304 }
  0xf1   :  { %v489_v41 = vadd.f32 %v488_v54, %v474_v27  ;;  %v363_v42 = vmax.f32 %v347_v39, 0.0  ;;  %v332_v34 = vmul.f32 %v805_v9, %v305_v40 }
  0xf2   :  { %v446_v43 = vpop.permute.xlu0 %445 }
  0xf3   :  { %v475_v44 = vmul.f32 %v446_v43, %v363_v42  ;;  %v348_v51 = vadd.f32 %v332_v34, %v248_v47 }
  0xf4   :  { %v309_v45 = vpop.permute.xlu1 %308 }
  0xf5   :  { %v490_v28 = vadd.f32 %v489_v41, %v475_v44  ;;  %v333_v46 = vmul.f32 %v805_v9, %v309_v45  ;;  %v364_v55 = vmax.f32 %v348_v51, 0.0 }
  0xf6   :  { %v456_v48 = vpop.permute.xlu0 %455 }
  0xf7   :  { %v349_v56 = vadd.f32 %v333_v46, %v249_v49 }
  0xf8   :  { %v313_v52 = vpop.permute.xlu1 %312 }
  0xf9   :  { %v334_v63 = vmul.f32 %v805_v9, %v313_v52  ;;  %v365_v53 = vmax.f32 %v349_v56, 0.0 }
  0xfb   :  { %v350_v23 = vadd.f32 %v334_v63, %v250_v15  ;;  %v477_v0 = vmul.f32 %v456_v48, %v365_v53 }
  0xfd   :  { %v451_v57 = vpop.permute.xlu1 %450  ;;  %v366_v1 = vmax.f32 %v350_v23, 0.0 }
  0xfe   :  { %v476_v61 = vmul.f32 %v451_v57, %v364_v55 }
 0x100   :  { %v491_v29 = vadd.f32 %v490_v28, %v476_v61 }
 0x101   :  { %v461_v38 = vpop.permute.xlu1 %460 }
 0x102   :  { %v478_v3 = vmul.f32 %v461_v38, %v366_v1  ;;  %v492_v4 = vadd.f32 %v491_v29, %v477_v0 }
 0x104   :  { %v493_v2 = vadd.f32 %v492_v4, %v478_v3 }
 0x106   :  { %v494_v8 = vrot.slane %v493_v2, 4 }
 0x108   :  { %v495_v30 = vadd.f32 %v494_v8, %v493_v2 }
 0x10a   :  { %v496_v6 = vrot.slane %v495_v30, 2 }
 0x10c   :  { %v497_v7 = vadd.f32 %v496_v6, %v495_v30 }
 0x10e   :  { %v498_v9 = vrot.slane %v497_v7, 1 }
 0x110   :  { %v499_v11 = vadd.f32 %v498_v9, %v497_v7 }
 0x112   :  { %v502_v12 = vadd.f32 %v501_v31, %v499_v11 }
 0x114   :  { %503 = vst [vmem:[#allocation3] sm:$0x1] %v502_v12 }
 0x115   :  { %539 = shalt.err (!%p536_p4)
}
 0x116   :  { %513 = dma.vmem_to_hbm [thread:$0]  %s511_s12, 16, %s889_s5, [#allocation4]  }
 0x117   :  { %548 = dma.done.wait [#allocation4], 16  }
 0x118   :  { %549 = vsyncadd [#allocation4], 4294967280 }
 0x119   :  { %517 = vsyncpa [#allocation4], 1 }

</bundles_post_ra>
